<compile_context>
chip_gen: v6e
topology: v6e:2x2x1
jax: 0.10.0
libtpu: 0.0.40
codegen_flags: <defaults>
</compile_context>

<pallas_src>
import math

import jax
import jax.numpy as jnp
from jax import lax
from jax.experimental import pallas as pl
from jax.experimental.pallas import tpu as pltpu


def pe_proj_kernel(yx_ref, cy_ref, cx_ref, w_ref, b_ref, o_ref):
    """One (batch, N-tile) grid step.

    yx_ref : (1, 2, TN)        row 0 = scaled y_embed, row 1 = scaled x_embed
    cy_ref : (hidden_dim, 1)   [1/dim_t_half ; 0]  phase coefficients for y
    cx_ref : (hidden_dim, 1)   [0 ; 1/dim_t_half]  phase coefficients for x
    w_ref  : (dim, enc_dim)    column-permuted / pre-scaled projection weight
    b_ref  : (dim, 1)          projection bias
    o_ref  : (1, dim, TN)
    """
    yx = yx_ref[0]                       # (2, TN)
    y = yx[0:1, :]                       # (1, TN)
    x = yx[1:2, :]                       # (1, TN)

    # (hidden_dim, TN) phases: rows [0, h/2) carry y-frequencies,
    # rows [h/2, h) carry x-frequencies.  Pure VPU broadcast-mul/add.
    phase = cy_ref[...] * y + cx_ref[...] * x

    # Features in the permuted channel order [sin | cos | y | x]; the 1/scale
    # of the last two reference channels is folded into w_ref.
    feat = jnp.concatenate([jnp.sin(phase), jnp.cos(phase), yx], axis=0)

    # Single merged GEMM over K = enc_dim, output (dim, TN) with N lane-dense.
    out = jnp.dot(w_ref[...], feat, preferred_element_type=jnp.float32)
    out = out + b_ref[...]
    o_ref[...] = out[None, :, :].astype(o_ref.dtype)


def positional_encoding_fourier_v2(B, Hp, Wp, conv_weight, conv_bias, *,
                                   hidden_dim, dim, temperature=10000,
                                   scale_factor=32, mask=None):
    """Matches PositionalEncodingFourierv2.forward; returns NCHW (B, dim, Hp, Wp)."""
    assert hidden_dim % 2 == 0, "hidden_dim must be even (as in the PyTorch module)"
    scale = math.pi * scale_factor
    enc_dim = (hidden_dim + 1) * 2
    half = hidden_dim // 2

    if mask is None:
        mask = jnp.zeros((B, Hp, Wp), dtype=bool)
    else:
        mask = mask.reshape(B, Hp, Wp)
    not_mask = jnp.logical_not(mask).astype(jnp.float32)

    y_cum = jnp.cumsum(not_mask, axis=1)
    x_cum = jnp.cumsum(not_mask, axis=2)
    y_embed = ((y_cum - 0.5) / y_cum[:, -1:, :] - 0.5) * 2.0 * scale
    x_embed = ((x_cum - 0.5) / x_cum[:, :, -1:] - 0.5) * 2.0 * scale

    N = Hp * Wp
    # (B, 2, N): channel-major so the kernel sees N on the lane axis
    # (lane-dense DMAs instead of width-1 lanes).
    yx = jnp.stack([y_embed.reshape(B, N), x_embed.reshape(B, N)], axis=1)

    # Half-width frequencies: dim_t[2k] == dim_t[2k+1] == T^(2k/hidden_dim).
    k = jnp.arange(half, dtype=jnp.float32)
    inv_half = (float(temperature) ** (-2.0 * k / hidden_dim)).astype(jnp.float32)
    zeros = jnp.zeros((half,), jnp.float32)
    cy = jnp.concatenate([inv_half, zeros]).reshape(hidden_dim, 1)
    cx = jnp.concatenate([zeros, inv_half]).reshape(hidden_dim, 1)

    # Conv2d(enc_dim, dim, 1) weight (dim, enc_dim, 1, 1) -> (dim, enc_dim);
    # permute its columns into the kernel's feature row order
    #   [sin_y(half), sin_x(half), cos_y(half), cos_x(half), y, x]
    # and fold 1/scale of the last two reference channels into the weight.
    w = conv_weight.reshape(dim, enc_dim).astype(jnp.float32)
    sin_y_cols = 2 * jnp.arange(half, dtype=jnp.int32)              # 0,2,...,h-2
    sin_x_cols = hidden_dim + 2 * jnp.arange(half, dtype=jnp.int32)  # h,h+2,...
    perm = jnp.concatenate([
        sin_y_cols, sin_x_cols, sin_y_cols + 1, sin_x_cols + 1,
        jnp.array([2 * hidden_dim, 2 * hidden_dim + 1], dtype=jnp.int32)])
    w_perm = w[:, perm]
    w_perm = w_perm.at[:, -2:].multiply(1.0 / scale)
    b2 = conv_bias.reshape(dim, 1).astype(jnp.float32)

    # N tiling: whole row when small, otherwise lane-aligned 2048-wide tiles
    # (keeps the output block well inside v7x's 64 MiB VMEM and gives the
    # grid enough parallel points for megacore sharding).
    TN = N if N <= 2048 else 2048
    grid = (B, pl.cdiv(N, TN))

    out = pl.pallas_call(
        pe_proj_kernel,
        out_shape=jax.ShapeDtypeStruct((B, dim, N), jnp.float32),
        grid=grid,
        in_specs=[
            pl.BlockSpec((1, 2, TN), lambda b, t: (b, 0, t)),
            pl.BlockSpec((hidden_dim, 1), lambda b, t: (0, 0)),
            pl.BlockSpec((hidden_dim, 1), lambda b, t: (0, 0)),
            pl.BlockSpec((dim, enc_dim), lambda b, t: (0, 0)),
            pl.BlockSpec((dim, 1), lambda b, t: (0, 0)),
        ],
        out_specs=pl.BlockSpec((1, dim, TN), lambda b, t: (b, 0, t)),
        compiler_params=pltpu.CompilerParams(
            dimension_semantics=("parallel", "parallel")),
    )(yx, cy, cx, w_perm, b2)

    # Free reshape back to PyTorch NCHW (no transpose needed).
    return out.reshape(B, dim, Hp, Wp)


def reference_jax(B, Hp, Wp, conv_weight, conv_bias, *, hidden_dim, dim,
                  temperature=10000, scale_factor=32, mask=None):
    """Pure-JAX transcription of the PyTorch forward (for verification)."""
    scale = math.pi * scale_factor
    enc_dim = (hidden_dim + 1) * 2
    if mask is None:
        mask = jnp.zeros((B, Hp, Wp), dtype=bool)
    not_mask = jnp.logical_not(mask).astype(jnp.float32)
    y_embed = jnp.cumsum(not_mask, axis=1)
    x_embed = jnp.cumsum(not_mask, axis=2)
    y_embed = ((y_embed - 0.5) / y_embed[:, -1:, :] - 0.5) * 2 * scale
    x_embed = ((x_embed - 0.5) / x_embed[:, :, -1:] - 0.5) * 2 * scale
    yx_un = jnp.stack([y_embed, x_embed], axis=-1) / scale
    dt = jnp.arange(hidden_dim, dtype=jnp.float32)
    dim_t = temperature ** (2.0 * jnp.floor(dt / 2.0) / hidden_dim)
    pos_x = x_embed[..., None] / dim_t
    pos_y = y_embed[..., None] / dim_t
    pos_x = jnp.stack([jnp.sin(pos_x[..., 0::2]), jnp.cos(pos_x[..., 1::2])],
                      axis=4).reshape(B, Hp, Wp, hidden_dim)
    pos_y = jnp.stack([jnp.sin(pos_y[..., 0::2]), jnp.cos(pos_y[..., 1::2])],
                      axis=4).reshape(B, Hp, Wp, hidden_dim)
    pos = jnp.concatenate([pos_y, pos_x, yx_un], axis=3)       # (B,Hp,Wp,enc)
    w = conv_weight.reshape(dim, enc_dim)
    out = jnp.einsum('bhwc,dc->bdhw', pos, w,
                     precision=lax.Precision.HIGHEST) + conv_bias[None, :, None, None]
    return out


if __name__ == "__main__":
    # small, forward-consistent shapes
    B, Hp, Wp = 2, 16, 16
    hidden_dim, dim = 8, 32
    enc_dim = (hidden_dim + 1) * 2          # 18

    key = jax.random.PRNGKey(0)
    kw, kb = jax.random.split(key)
    conv_weight = 0.1 * jax.random.normal(kw, (dim, enc_dim, 1, 1), dtype=jnp.float32)
    conv_bias = 0.1 * jax.random.normal(kb, (dim,), dtype=jnp.float32)

    out = positional_encoding_fourier_v2(B, Hp, Wp, conv_weight, conv_bias,
                                         hidden_dim=hidden_dim, dim=dim)
    out = jax.block_until_ready(out)
    assert out.shape == (B, dim, Hp, Wp), out.shape

    ref = reference_jax(B, Hp, Wp, conv_weight, conv_bias,
                        hidden_dim=hidden_dim, dim=dim)
    ref = jax.block_until_ready(ref)
    assert jnp.allclose(out, ref, atol=1e-2, rtol=1e-2), \
        float(jnp.max(jnp.abs(out - ref)))

    print("KERNEL_OK")
</pallas_src>

<mosaic_0001>
module attributes {stable_mosaic.version = 11 : i64} {
  func.func @pe_proj_kernel(%arg0: i32, %arg1: i32, %arg2: memref<1x2x256xf32, #tpu.memory_space<vmem>>, %arg3: memref<8x1xf32, #tpu.memory_space<vmem>>, %arg4: memref<8x1xf32, #tpu.memory_space<vmem>>, %arg5: memref<32x18xf32, #tpu.memory_space<vmem>>, %arg6: memref<32x1xf32, #tpu.memory_space<vmem>>, %arg7: memref<1x32x256xf32, #tpu.memory_space<vmem>>) attributes {dimension_semantics = [#tpu.dimension_semantics<parallel>, #tpu.dimension_semantics<parallel>], iteration_bounds = array<i64: 2, 1>, scalar_prefetch = 0 : i64, scratch_operands = 0 : i64, tpu.core_type = #tpu.core_type<tc>, window_params = [{transform_indices = @transform_0, window_bounds = array<i64: 1, 2, 256>}, {pipeline_mode = #tpu.pipeline_mode<synchronous>, transform_indices = @transform_1, window_bounds = array<i64: 8, 1>}, {pipeline_mode = #tpu.pipeline_mode<synchronous>, transform_indices = @transform_2, window_bounds = array<i64: 8, 1>}, {pipeline_mode = #tpu.pipeline_mode<synchronous>, transform_indices = @transform_3, window_bounds = array<i64: 32, 18>}, {pipeline_mode = #tpu.pipeline_mode<synchronous>, transform_indices = @transform_4, window_bounds = array<i64: 32, 1>}, {transform_indices = @transform_5, window_bounds = array<i64: 1, 32, 256>}]} {
    %c0 = arith.constant 0 : index
    %c0_0 = arith.constant 0 : index
    %c0_1 = arith.constant 0 : index
    %0 = vector.load %arg2[%c0, %c0_0, %c0_1] : memref<1x2x256xf32, #tpu.memory_space<vmem>>, vector<1x2x256xf32>
    %1 = vector.shape_cast %0 : vector<1x2x256xf32> to vector<2x256xf32>
    %2 = vector.extract_strided_slice %1 {offsets = [0, 0], sizes = [1, 256], strides = [1, 1]} : vector<2x256xf32> to vector<1x256xf32>
    %3 = vector.extract_strided_slice %1 {offsets = [1, 0], sizes = [1, 256], strides = [1, 1]} : vector<2x256xf32> to vector<1x256xf32>
    %c0_2 = arith.constant 0 : index
    %c0_3 = arith.constant 0 : index
    %4 = vector.load %arg3[%c0_2, %c0_3] : memref<8x1xf32, #tpu.memory_space<vmem>>, vector<8x1xf32>
    %5 = vector.broadcast %4 : vector<8x1xf32> to vector<8x256xf32>
    %6 = vector.broadcast %2 : vector<1x256xf32> to vector<8x256xf32>
    %7 = arith.mulf %5, %6 : vector<8x256xf32>
    %c0_4 = arith.constant 0 : index
    %c0_5 = arith.constant 0 : index
    %8 = vector.load %arg4[%c0_4, %c0_5] : memref<8x1xf32, #tpu.memory_space<vmem>>, vector<8x1xf32>
    %9 = vector.broadcast %8 : vector<8x1xf32> to vector<8x256xf32>
    %10 = vector.broadcast %3 : vector<1x256xf32> to vector<8x256xf32>
    %11 = arith.mulf %9, %10 : vector<8x256xf32>
    %12 = arith.addf %7, %11 : vector<8x256xf32>
    %13 = math.sin %12 : vector<8x256xf32>
    %14 = math.cos %12 : vector<8x256xf32>
    %15 = tpu.concatenate %13, %14, %1 in 0 : vector<8x256xf32>, vector<8x256xf32>, vector<2x256xf32> -> vector<18x256xf32>
    %c0_6 = arith.constant 0 : index
    %c0_7 = arith.constant 0 : index
    %16 = vector.load %arg5[%c0_6, %c0_7] : memref<32x18xf32, #tpu.memory_space<vmem>>, vector<32x18xf32>
    %cst = arith.constant dense<0.000000e+00> : vector<32x256xf32>
    %17 = tpu.matmul %16, %15, %cst {dimension_numbers = #tpu.dot_dimension_numbers<[1], [0], [0], [1], [0, 0, 1, 1], [], []>} : vector<32x18xf32>, vector<18x256xf32>, vector<32x256xf32> -> vector<32x256xf32>
    %c0_8 = arith.constant 0 : index
    %c0_9 = arith.constant 0 : index
    %18 = vector.load %arg6[%c0_8, %c0_9] : memref<32x1xf32, #tpu.memory_space<vmem>>, vector<32x1xf32>
    %19 = vector.broadcast %18 : vector<32x1xf32> to vector<32x256xf32>
    %20 = arith.addf %17, %19 : vector<32x256xf32>
    %21 = vector.shape_cast %20 : vector<32x256xf32> to vector<1x32x256xf32>
    %c0_10 = arith.constant 0 : index
    %c0_11 = arith.constant 0 : index
    %c0_12 = arith.constant 0 : index
    %22 = vector.load %arg7[%c0_10, %c0_11, %c0_12] : memref<1x32x256xf32, #tpu.memory_space<vmem>>, vector<1x32x256xf32>
    tpu.vector_store %arg7[%c0_10, %c0_11, %c0_12], %21 {strides = array<i32>} : memref<1x32x256xf32, #tpu.memory_space<vmem>>, vector<1x32x256xf32>,
    return
  }
  func.func @transform_0(%arg0: i32, %arg1: i32) -> (i32, i32, i32) {
    %c0_i32 = arith.constant 0 : i32
    %c0_i32_0 = arith.constant 0 : i32
    return %arg0, %c0_i32, %arg1 : i32, i32, i32
  }
  func.func @transform_1(%arg0: i32, %arg1: i32) -> (i32, i32) {
    %c0_i32 = arith.constant 0 : i32
    %c0_i32_0 = arith.constant 0 : i32
    %c0_i32_1 = arith.constant 0 : i32
    return %c0_i32, %c0_i32_0 : i32, i32
  }
  func.func @transform_2(%arg0: i32, %arg1: i32) -> (i32, i32) {
    %c0_i32 = arith.constant 0 : i32
    %c0_i32_0 = arith.constant 0 : i32
    %c0_i32_1 = arith.constant 0 : i32
    return %c0_i32, %c0_i32_0 : i32, i32
  }
  func.func @transform_3(%arg0: i32, %arg1: i32) -> (i32, i32) {
    %c0_i32 = arith.constant 0 : i32
    %c0_i32_0 = arith.constant 0 : i32
    %c0_i32_1 = arith.constant 0 : i32
    return %c0_i32, %c0_i32_0 : i32, i32
  }
  func.func @transform_4(%arg0: i32, %arg1: i32) -> (i32, i32) {
    %c0_i32 = arith.constant 0 : i32
    %c0_i32_0 = arith.constant 0 : i32
    %c0_i32_1 = arith.constant 0 : i32
    return %c0_i32, %c0_i32_0 : i32, i32
  }
  func.func @transform_5(%arg0: i32, %arg1: i32) -> (i32, i32, i32) {
    %c0_i32 = arith.constant 0 : i32
    %c0_i32_0 = arith.constant 0 : i32
    return %arg0, %c0_i32, %arg1 : i32, i32, i32
  }
}

</mosaic_0001>

<bundles_post_ra>
// kernel: tpu_custom_call.1
= control target key start
LH: loop header
LB: loop body
LE: loop exit
PB: predicated region body
PF: predicated region fallthrough
CT: control target
= control target key end

     0   :  { %10 = vsyncpa [#allocation3], 0  ;;  %s1447_s0 = inlined_call_operand.vmem [shape: f32[2,2,256], index: 0, kind: input, shape index: {}]   ;;  %s1448_s1 = inlined_call_operand.vmem [shape: f32[8,1], index: 1, kind: input, shape index: {}]   ;;  %s1449_s2 = inlined_call_operand.vmem [shape: f32[8,1], index: 2, kind: input, shape index: {}]   ;;  %s1450_s3 = inlined_call_operand.vmem [shape: f32[32,18], index: 3, kind: input, shape index: {}]   ;;  %s1451_s4 = inlined_call_operand.vmem [shape: f32[32,1], index: 4, kind: input, shape index: {}]   ;;  %s1452_s5 = inlined_call_operand.hbm [shape: f32[2,32,256], index: 5, kind: output, shape index: {}]  }
   0x1   :  { %12 = vsyncpa [#allocation3 + $0x1], 0  ;;  %s1217_s18 = smov 0   ;;  %s1219_s19 = smov 0  }
   0x2   :  { %s1221_s20 = smov 0   ;;  %s1223_s21 = smov 0  }
   0x3   :  { %s1225_s22 = smov 0   ;;  %s1227_s23 = smov 0  }
   0x4 LB: > { %s970_s24 = sadd.s32 4294967295, %s1173_s23   ;;  %s971_s25 = sadd.s32 4294967294, %s1173_s23   ;;  %s1173_s23 = sphi %s1227_s23, %s18_s23   ;;  %s1169_s22 = sphi %s1225_s22, %s1461_s22   ;;  %s1165_s21 = sphi %s1223_s21, %s1460_s21   ;;  %s1161_s20 = sphi %s1221_s20, %s1459_s20   ;;  %s1157_s19 = sphi %s1219_s19, %s1458_s19   ;;  %s1153_s18 = sphi %s1217_s18, %s1457_s18  }
   0x5   : > { %s30_s26 = sadd.s32 1, %s1169_s22  ;;  %s151_s27 = sadd.s32 1, %s1161_s20 }
   0x6   : > { %p32_p0 = scmp.ge.s32.totalorder %s30_s26, 2  ;;  %p161_p1 = scmp.ne.s32.totalorder %s1161_s20, %s1157_s19 }
   0x7   : > { %p162_p2 = scmp.eq.s32.totalorder %s970_s24, 1  ;;  %p167_p3 = scmp.ne.s32.totalorder %s1157_s19, %s1153_s18 }
   0x8   : > { %s1463_s26 = smov (%p32_p0, %s30_s26), 0  ;;  %p168_p5 = scmp.eq.s32.totalorder %s971_s25, 1 }
   0x9   : > { %p1257_p4 = por %p162_p2, %p161_p1  ;;  %s146_s29 = ssub.s32 %s1169_s22, %s1463_s26 }
   0xa   : > { %p974_p6 = scmp.ge.s32.totalorder %s1173_s23, 1  ;;  %p149_p7 = scmp.eq.s32.totalorder %s146_s29, 0 }
   0xb   : > { %p1264_p8 = por %p168_p5, %p167_p3  ;;  %p211_p9 = scmp.lt.s32.totalorder %s1173_s23, 3 }
   0xc   : > { %s1270_s6 = scalar_select %p149_p7, %s1161_s20, %s151_s27  }
   0xd   : > { %p212_p10 = pnand %p974_p6, %p211_p9 }
   0xe   : > { %p244_p11 = scmp.lt.s32.totalorder (!%p212_p10), %s1165_s21, 1  ;;  %s240_s17 = sand.u32 (!%p212_p10), 1, %s1157_s19  }
   0xf   : > { %215 = sbr.rel (%p212_p10) target bundleno = 464 (0x1d0), region = 40  ;;  %s975_s24 = sshll.u32 (!%p212_p10), %s240_s17, 6 }
  0x10   : > { %s242_s25 = scalar_lea.vmem (!%p212_p10), [#allocation2], %s975_s24  ;;  %s1006_s27 = sshll.u32 (!%p212_p10), %s1165_s21, 10 }
  0x11   : > { %s891_s29 = sshll.u32 (!%p212_p10), %s242_s25, 4  ;;  %s1184_s11 = smov (!%p212_p10), [#allocation2]   ;;  %s1398_s29 = int_to_ptr.vmem [resolvable:$true] %s891_s29 }
  0x12   : > { %s1097_s10 = scalar_lea.vmem (!%p212_p10), %s1398_s29, 1024 }
  0x13   : > { %p1098_p12 = scmp.ne.s32.totalorder (!%p212_p10), %s1398_s29, %s1097_s10 }
  0x14   : > { %v255_v0 = vld [vmem:[%s1448_s1] sm:$0xff]  ;;  %v262_v1 = vlaneseq  ;;  %v1175_v2 = vmov 0   ;;  %s245_s9 = scalar_select %p244_p11, %s1165_s21, 1  ;;  %v738_v10 = vld [vmem:[%s1451_s4 + $0x10] sm:$0xff]  ;;  %v1176_v19 = vmov 1983009808  }
  0x15   : > { %1087 = vset.pattern.permute.xlu0 %v1175_v2  ;;  %1088 = vset.pattern.permute.xlu1 %v1175_v2  ;;  %v282_v4 = vld [vmem:[%s1449_s2] sm:$0xff]  ;;  %v725_v20 = vunpack.c.l.s4 %v1176_v19  ;;  %vm773_vm0 = vcmask 1041408   ;;  %v1177_v25 = vmov 0.0   ;;  %v737_v27 = vld [vmem:[%s1451_s4 + $0x8] sm:$0xff]  ;;  %v739_v28 = vld [vmem:[%s1451_s4 + $0x18] sm:$0xff]  ;;  %s1402_s21 = scalar_lea.sflag [#allocation3], %s240_s17  ;;  %p1099_p13 = pnand %p1098_p12, %p1257_p4 }
  0x16   : > { %258 = vperm.xlu0 %1087, %v255_v0   ;;  %v263_v3 = vshrl.u32 %v262_v1, 7  ;;  %s1005_s12 = sshll.u32 %s245_s9, 2  ;;  %842 = vmatprep.mubr.f32.mxu0 %v1177_v25  ;;  %v736_v26 = vld [vmem:[%s1451_s4] sm:$0xff]  ;;  %v1178_v61 = vmov 683565275   ;;  %s1396_s9 = scalar_lea.hbm %s1452_s5, %s1006_s27 }
  0x17   : > { %s251_s15 = scalar_lea.vmem %s1447_s0, %s1005_s12  ;;  %v726_v21 = vunpack.c.0.s8 %v725_v20  ;;  %854 = vmatprep.mubr.f32.mxu1 %v1177_v25  ;;  %742 = vperm.xlu1 %1088, %v736_v26   ;;  %v1179_v63 = vmov 2475754826   ;;  %v1180_v1 = vmov 2131351028   ;;  %p1100_p0 = pneg %p1099_p13 }
  0x18   : > { %v264_v5 = vsub.s32 0, %v263_v3  ;;  %v268_v6 = vsub.s32 2, %v263_v3  ;;  %v290_v7 = vsub.s32 1, %v263_v3  ;;  %v294_v8 = vsub.s32 3, %v263_v3  ;;  %v254_v9 = vld [vmem:[%s251_s15] sm:$0xf] }
  0x19   : > { %v729_v22 = vsub.s32 %v726_v21, %v263_v3  ;;  %s1101_s12 = sshll.u32 %s1184_s11, 4  ;;  %s1102_s12 = int_to_ptr.vmem [resolvable:$false] %s1101_s12 }
  0x1a   : > { %285 = vperm.xlu0 %1087, %v282_v4   ;;  %v265_v11 = vrot.slane %v254_v9, %v264_v5  ;;  %v269_v12 = vrot.slane %v254_v9, %v268_v6  ;;  %v291_v13 = vrot.slane %v254_v9, %v290_v7  ;;  %v295_v14 = vrot.slane %v254_v9, %v294_v8  ;;  %s1103_s13 = scalar_lea.vmem %s1102_s12, 2048  ;;  %p1104_p1 = scmp.lt.s32.totalorder %s1398_s29, %s1102_s12 }
  0x1b   : > { %v730_v23 = vrot.slane %v254_v9, %v729_v22  ;;  %747 = vperm.xlu1 %1088, %v737_v27   ;;  %v1182_v8 = vmov 920167782   ;;  %p1105_p2 = scmp.lt.s32.totalorder %s1103_s13, %s1097_s10 }
  0x1c   : > { %v275_v15 = vrot.slane %v265_v11, %v264_v5  ;;  %v279_v16 = vrot.slane %v269_v12, %v264_v5  ;;  %v301_v17 = vrot.slane %v291_v13, %v290_v7  ;;  %v305_v18 = vrot.slane %v295_v14, %v290_v7 }
  0x1d   : > { %v731_v24 = vcombine.high %v730_v23, %v730_v23  ;;  %v1181_v5 = vmov 2102212464   ;;  %v1183_v11 = vmov 1326507024   ;;  %p1106_p3 = por %p1105_p2, %p1104_p1 }
  0x1e   : > { %752 = vperm.xlu0 %1087, %v738_v10  }
  0x1f   : > { %994 = vmatprep.subr.msk.mxu0 %vm773_vm0, %v731_v24  ;;  %1007 = vmatprep.subr.msk.mxu1 %vm773_vm0, %v731_v24  ;;  %p1107_p5 = pnand %p1106_p3, %p1100_p0 }
  0x20   : > { %995 = vmatpush1.msk.msra.mxu0 %vm773_vm0, %v730_v23  ;;  %1010 = vmatpush1.msk.msra.mxu1 %vm773_vm0, %v730_v23 }
  0x21   : > { %757 = vperm.xlu1 %1088, %v739_v28  }
  0x91   : > { %v259_v29 = vpop.permute.xlu0 %258 }
  0x92   : > { %v280_v31 = vmul.f32 %v275_v15, %v259_v29  ;;  %v281_v32 = vmul.f32 %v279_v16, %v259_v29 }
  0x95   : > { %v286_v30 = vpop.permute.xlu0 %285 }
  0x96   : > { %v306_v33 = vmul.f32 %v301_v17, %v286_v30  ;;  %v307_v34 = vmul.f32 %v305_v18, %v286_v30 }
  0x98   : > { %v1297_v35 = vadd.f32 %v306_v33, %v280_v31  ;;  %v1299_v36 = vadd.f32 %v307_v34, %v281_v32 }
  0x9a   : > { %v313_v37 = vand.u32 2139095040, %v1297_v35  ;;  %v417_v38 = vand.u32 2139095040, %v1299_v36  ;;  %v414_v39 = vand.u32 2147483647, %v1299_v36  ;;  %v310_v40 = vand.u32 2147483647, %v1297_v35 }
  0x9b   : > { %vm416_vm15 = vcmp.lt.s32.totalorder %v1299_v36, 0 }
  0x9c   : > { %v314_v41 = vshrl.u32 %v313_v37, 23  ;;  %v418_v42 = vshrl.u32 %v417_v38, 23  ;;  %v421_v45 = vand.u32 8388607, %v414_v39  ;;  %v317_v46 = vand.u32 8388607, %v310_v40 }
  0x9d   : > { %vm1356_vm0 = vcmp.le.f32.partialorder %v414_v39, 0.7853982 }
  0x9e   : > { %v978_v43 = vadd.s32 4294967169, %v314_v41  ;;  %v982_v44 = vadd.s32 4294967169, %v418_v42  ;;  %v422_v49 = vor.u32 8388608, %v421_v45  ;;  %v318_v50 = vor.u32 8388608, %v317_v46 }
  0xa0   : > { %v320_v47 = vadd.s32 1, %v978_v43  ;;  %v424_v48 = vadd.s32 1, %v982_v44  ;;  %v1313_v58 = vshll.u32 %v422_v49, 8  ;;  %v1315_v59 = vshll.u32 %v318_v50, 8 }
  0xa2   : > { %vm321_vm1 = vcmp.gt.s32.totalorder %v320_v47, 0  ;;  %vm425_vm2 = vcmp.gt.s32.totalorder %v424_v48, 0 }
  0xa3   : > { %v322_v51 = vsel %vm321_vm1, %v320_v47, 0  ;;  %v426_v52 = vsel %vm425_vm2, %v424_v48, 0  ;;  %vm312_vm1 = vcmp.lt.s32.totalorder %v1297_v35, 0  ;;  %vm311_vm2 = vcmp.le.f32.partialorder %v310_v40, 0.7853982 }
  0xa4   : > { %v1309_v53 = vand.u32 31, %v322_v51  ;;  %v428_v54 = vand.u32 31, %v426_v52  ;;  %v427_v55 = vshrl.u32 %v426_v52, 5  ;;  %v1311_v56 = vshrl.u32 %v322_v51, 5 }
  0xa6   : > { %v429_v57 = vsub.s32 32, %v428_v54  ;;  %v325_v60 = vsub.s32 32, %v1309_v53  ;;  %v431_v62 = vshll.u32 %v1178_v61, %v428_v54  ;;  %v434_v0 = vshll.u32 %v1179_v63, %v428_v54 }
  0xa7   : > { %v437_v2 = vshll.u32 %v1180_v1, %v428_v54  ;;  %v440_v7 = vshll.u32 %v1181_v5, %v428_v54  ;;  %v443_v10 = vshll.u32 %v1182_v8, %v428_v54  ;;  %vm446_vm3 = vcmp.lt.s32.totalorder %v427_v55, 1 }
  0xa8   : > { %v432_v3 = vshrl.u32 %v1179_v63, %v429_v57  ;;  %v435_v4 = vshrl.u32 %v1180_v1, %v429_v57  ;;  %v438_v6 = vshrl.u32 %v1181_v5, %v429_v57  ;;  %v441_v9 = vshrl.u32 %v1182_v8, %v429_v57 }
  0xa9   : > { %v444_v12 = vshrl.u32 %v1183_v11, %v429_v57  ;;  %v430_v13 = vshrl.u32 %v1178_v61, %v429_v57  ;;  %vm448_vm4 = vcmp.lt.s32.totalorder %v427_v55, 3  ;;  %vm449_vm5 = vcmp.lt.s32.totalorder %v427_v55, 4 }
  0xaa   : > { %v433_v14 = vor.u32 %v432_v3, %v431_v62  ;;  %v436_v15 = vor.u32 %v435_v4, %v434_v0  ;;  %v439_v16 = vor.u32 %v438_v6, %v437_v2  ;;  %v442_v17 = vor.u32 %v441_v9, %v440_v7 }
  0xab   : > { %v445_v18 = vor.u32 %v444_v12, %v443_v10  ;;  %v328_v27 = vshrl.u32 %v1179_v63, %v325_v60  ;;  %vm447_vm6 = vcmp.lt.s32.totalorder %v427_v55, 2  ;;  %v327_v30 = vshll.u32 %v1178_v61, %v1309_v53 }
  0xac   : > { %v450_v19 = vsel %vm446_vm3, %v430_v13, %v433_v14  ;;  %v451_v20 = vsel %vm449_vm5, %v439_v16, 2102212464  ;;  %v454_v21 = vsel %vm446_vm3, %v433_v14, %v436_v15  ;;  %v458_v22 = vsel %vm446_vm3, %v436_v15, %v439_v16 }
  0xad   : > { %v452_v23 = vsel %vm448_vm4, %v436_v15, %v451_v20  ;;  %v455_v24 = vsel %vm449_vm5, %v442_v17, 920167782  ;;  %v459_v26 = vsel %vm449_vm5, %v445_v18, 1326507024  ;;  %v330_v34 = vshll.u32 %v1179_v63, %v1309_v53 }
  0xae   : > { %v456_v28 = vsel %vm448_vm4, %v439_v16, %v455_v24  ;;  %v460_v29 = vsel %vm448_vm4, %v442_v17, %v459_v26  ;;  %v453_v31 = vsel %vm447_vm6, %v450_v19, %v452_v23  ;;  %v329_v43 = vor.u32 %v328_v27, %v327_v30 }
  0xaf   : > { %v457_v32 = vsel %vm447_vm6, %v454_v21, %v456_v28  ;;  %v461_v33 = vsel %vm447_vm6, %v458_v22, %v460_v29  ;;  %v331_v44 = vshrl.u32 %v1180_v1, %v325_v60  ;;  %v333_v45 = vshll.u32 %v1180_v1, %v1309_v53 }
  0xb0   : > { %v1321_v37 = vmul.u32.u64.low %v1313_v58, %v461_v33  ;;  %v1322_v38 = vmul.u32.u64.high %v1313_v58, %v461_v33, %v1321_v37  ;;  %v1325_v41 = vmul.u32.u64.low %v1313_v58, %v457_v32  ;;  %v1326_v42 = vmul.u32.u64.high %v1313_v58, %v457_v32, %v1325_v41 }
  0xb1   : > { %v334_v46 = vshrl.u32 %v1181_v5, %v325_v60  ;;  %v326_v47 = vshrl.u32 %v1178_v61, %v325_v60  ;;  %v336_v48 = vshll.u32 %v1181_v5, %v1309_v53  ;;  %v337_v49 = vshrl.u32 %v1182_v8, %v325_v60 }
  0xb2   : > { %v340_v50 = vshrl.u32 %v1183_v11, %v325_v60  ;;  %v469_v51 = vmul.u32 %v1313_v58, %v453_v31  ;;  %v332_v52 = vor.u32 %v331_v44, %v330_v34  ;;  %v339_v55 = vshll.u32 %v1182_v8, %v1309_v53 }
  0xb3   : > { %v335_v54 = vor.u32 %v334_v46, %v333_v45  ;;  %vm471_vm7 = vc.u32 %v1322_v38, %v1325_v41  ;;  %v472_v57 = vadd.s32 1, %v1326_v42  ;;  %v338_v62 = vor.u32 %v337_v49, %v336_v48 }
  0xb4   : > { %vm342_vm8 = vcmp.lt.s32.totalorder %v1311_v56, 1  ;;  %v341_v63 = vor.u32 %v340_v50, %v339_v55  ;;  %vm344_vm9 = vcmp.lt.s32.totalorder %v1311_v56, 3  ;;  %vm345_vm10 = vcmp.lt.s32.totalorder %v1311_v56, 4 }
  0xb5   : > { %v350_v61 = vsel %vm342_vm8, %v329_v43, %v332_v52  ;;  %v473_v60 = vsel %vm471_vm7, %v472_v57, %v1326_v42  ;;  %v347_v58 = vsel %vm345_vm10, %v335_v54, 2102212464  ;;  %v351_v0 = vsel %vm345_vm10, %v338_v62, 920167782 }
  0xb6   : > { %v354_v1 = vsel %vm342_vm8, %v332_v52, %v335_v54  ;;  %v474_v2 = vadd.s32 %v473_v60, %v469_v51  ;;  %vm343_vm11 = vcmp.lt.s32.totalorder %v1311_v56, 2  ;;  %v352_v53 = vsel %vm344_vm9, %v335_v54, %v351_v0 }
  0xb7   : > { %v355_v3 = vsel %vm345_vm10, %v341_v63, 1326507024  ;;  %v346_v4 = vsel %vm342_vm8, %v326_v47, %v329_v43  ;;  %v348_v5 = vsel %vm344_vm9, %v332_v52, %v347_v58  ;;  %v353_v6 = vsel %vm343_vm11, %v350_v61, %v352_v53 }
  0xb8   : > { %v356_v7 = vsel %vm344_vm9, %v338_v62, %v355_v3  ;;  %v475_v8 = vadd.s32 536870912, %v474_v2  ;;  %v1340_v10 = vmul.u32.u64.low %v1315_v59, %v353_v6  ;;  %v1341_v11 = vmul.u32.u64.high %v1315_v59, %v353_v6, %v1340_v10 }
  0xb9   : > { %v357_v9 = vsel %vm343_vm11, %v354_v1, %v356_v7  ;;  %v349_v15 = vsel %vm343_vm11, %v346_v4, %v348_v5  ;;  %v470_v32 = vadd.s32 %v1325_v41, %v1322_v38  ;;  %vm506_vm6 = vweird.f32 %v1299_v36 }
  0xba   : > { %v1344_v12 = vmul.u32.u64.low %v1315_v59, %v357_v9  ;;  %v1345_v13 = vmul.u32.u64.high %v1315_v59, %v357_v9, %v1344_v12  ;;  %v476_v14 = vshrl.u32 %v475_v8, 30  ;;  %v368_v56 = vadd.s32 1, %v1341_v11 }
  0xbb   : > { %v365_v17 = vmul.u32 %v1315_v59, %v349_v15 }
  0xbc   : > { %v477_v16 = vshll.u32 %v476_v14, 30  ;;  %vm367_vm12 = vc.u32 %v1345_v13, %v1340_v10  ;;  %v366_v52 = vadd.s32 %v1340_v10, %v1345_v13  ;;  %v500_v53 = vsub.s32 4, %v476_v14 }
  0xbd   : > { %v369_v19 = vsel %vm367_vm12, %v368_v56, %v1341_v11 }
  0xbe   : > { %v478_v18 = vsub.s32 %v474_v2, %v477_v16  ;;  %v370_v20 = vadd.s32 %v369_v19, %v365_v17  ;;  %v501_v6 = vsel %vm416_vm15, %v500_v53, %v476_v14 }
  0xbf   : > { %v503_v9 = vsel %vm1356_vm0, 0, %v501_v6 }
  0xc0   : > { %v480_v21 = vsub.s32 0, %v478_v18  ;;  %v371_v22 = vadd.s32 536870912, %v370_v20  ;;  %v714_v12 = vand.u32 3, %v503_v9  ;;  %v507_v56 = vadd.s32 3, %v503_v9 }
  0xc2   : > { %v983_v23 = vmin.u32 %v480_v21, %v478_v18  ;;  %v372_v24 = vshrl.u32 %v371_v22, 30  ;;  %vm719_vm3 = vcmp.eq.s32.totalorder %v714_v12, 2  ;;  %vm716_vm4 = vcmp.eq.s32.totalorder %v714_v12, 0 }
  0xc3   : > { %vm715_vm5 = vcmp.lt.s32.totalorder %v714_v12, 2  ;;  %v508_v21 = vand.u32 3, %v507_v56 }
  0xc4   : > { %v482_v26 = vclz %v983_v23  ;;  %v373_v27 = vshll.u32 %v372_v24, 30  ;;  %v396_v39 = vsub.s32 4, %v372_v24 }
  0xc5   : > { %vm510_vm7 = vcmp.eq.s32.totalorder %v508_v21, 0  ;;  %vm513_vm8 = vcmp.eq.s32.totalorder %v508_v21, 2  ;;  %vm509_vm9 = vcmp.lt.s32.totalorder %v508_v21, 2 }
  0xc6   : > { %v984_v28 = vadd.s32 4294967294, %v482_v26  ;;  %v374_v29 = vsub.s32 %v370_v20, %v373_v27  ;;  %v397_v11 = vsel %vm312_vm1, %v396_v39, %v372_v24 }
  0xc7   : > { %v399_v15 = vsel %vm311_vm2, 0, %v397_v11 }
  0xc8   : > { %vm985_vm13 = vcmp.lt.s32.totalorder %v984_v28, 0  ;;  %v376_v31 = vsub.s32 0, %v374_v29  ;;  %v403_v40 = vadd.s32 3, %v399_v15  ;;  %v611_v23 = vand.u32 3, %v399_v15 }
  0xc9   : > { %v485_v30 = vsel %vm985_vm13, 0, %v984_v28 }
  0xca   : > { %v486_v59 = vsub.s32 32, %v485_v30  ;;  %v490_v33 = vsub.s32 4294967266, %v485_v30  ;;  %v979_v34 = vmin.u32 %v376_v31, %v374_v29  ;;  %v487_v37 = vshll.u32 %v478_v18, %v485_v30 }
  0xcb   : > { %v404_v24 = vand.u32 3, %v403_v40  ;;  %vm612_vm10 = vcmp.lt.s32.totalorder %v611_v23, 2  ;;  %vm616_vm11 = vcmp.eq.s32.totalorder %v611_v23, 2  ;;  %vm613_vm13 = vcmp.eq.s32.totalorder %v611_v23, 0 }
  0xcc   : > { %v488_v42 = vshrl.u32 %v470_v32, %v486_v59  ;;  %v491_v43 = vadd.s32 127, %v490_v33  ;;  %v378_v44 = vclz %v979_v34 }
  0xcd   : > { %vm409_vm12 = vcmp.eq.s32.totalorder %v404_v24, 2 }
  0xce   : > { %v489_v45 = vor.u32 %v488_v42, %v487_v37  ;;  %v492_v46 = vshll.u32 %v491_v43, 23  ;;  %v980_v47 = vadd.s32 4294967294, %v378_v44 }
  0xd0   : > { %v493_v48 = vor.u32 4788187, %v492_v46  ;;  %vm981_vm14 = vcmp.lt.s32.totalorder %v980_v47, 0  ;;  %v496_v50 = vcvt.s32.f32 %v489_v45  ;;  %v732_v46 = vld [vmem:[%s1450_s3] sm:$0xff] }
  0xd1   : > { %v381_v51 = vsel %vm981_vm14, 0, %v980_v47  ;;  %vm406_vm14 = vcmp.eq.s32.totalorder %v404_v24, 0  ;;  %v734_v47 = vld [vmem:[%s1450_s3 + $0x10] sm:$0xff] }
  0xd2   : > { %v494_v49 = vand.u32 2147483647, %v493_v48  ;;  %v382_v54 = vsub.s32 32, %v381_v51  ;;  %v386_v55 = vsub.s32 4294967266, %v381_v51  ;;  %v383_v41 = vshll.u32 %v374_v29, %v381_v51  ;;  %v735_v48 = vld [vmem:[%s1450_s3 + $0x18] sm:$0xff]  ;;  %v753_v51 = vpop.permute.xlu0 %752 }
  0xd4   : > { %v497_v38 = vmul.f32 %v496_v50, %v494_v49  ;;  %v384_v57 = vshrl.u32 %v366_v52, %v382_v54  ;;  %v387_v62 = vadd.s32 127, %v386_v55  ;;  %v743_v49 = vpop.permute.xlu1 %742 }
  0xd6   : > { %v498_v63 = vxor.u32 2147483648, %v497_v38  ;;  %v385_v61 = vor.u32 %v384_v57, %v383_v41  ;;  %v388_v60 = vshll.u32 %v387_v62, 23 }
  0xd8   : > { %v499_v0 = vsel %vm416_vm15, %v498_v63, %v497_v38  ;;  %v389_v2 = vor.u32 4788187, %v388_v60  ;;  %v392_v4 = vcvt.s32.f32 %v385_v61  ;;  %vm405_vm15 = vcmp.lt.s32.totalorder %v404_v24, 2  ;;  %v748_v50 = vpop.permute.xlu1 %747 }
  0xd9   : > { %v502_v1 = vsel %vm1356_vm0, %v1299_v36, %v499_v0  ;;  %vm402_vm0 = vweird.f32 %v1297_v35  ;;  %v733_v36 = vld [vmem:[%s1450_s3 + $0x8] sm:$0xff] }
  0xda   : > { %1089 = vcosq.f32 %v502_v1  ;;  %v390_v3 = vand.u32 2147483647, %v389_v2 }
  0xdb   : > { %1091 = vsinq.f32 %v502_v1 }
  0xdc   : > { %v393_v5 = vmul.f32 %v392_v4, %v390_v3  ;;  %v758_v57 = vpop.permute.xlu1 %757 }
  0xde   : > { %v394_v7 = vxor.u32 2147483648, %v393_v5 }
  0xe0   : > { %v395_v8 = vsel %vm312_vm1, %v394_v7, %v393_v5  ;;  %vm760_vm1 = vcmask 146432  }
  0xe1   : > { %v398_v10 = vsel %vm311_vm2, %v1297_v35, %v395_v8 }
  0xe2   : > { %1093 = vcosq.f32 %v398_v10 }
  0xe3   : > { %1095 = vsinq.f32 %v398_v10 }
  0xe7   : > { %v1090_v13 = vpop.eup %1089 }
  0xe8   : > { %v1092_v14 = vpop.eup %1091  ;;  %v514_v16 = vxor.u32 2147483648, %v1090_v13 }
  0xe9   : > { %v511_v17 = vxor.u32 2147483648, %v1092_v14 }
  0xea   : > { %v721_v18 = vsel %vm719_vm3, %v514_v16, %v1092_v14  ;;  %v515_v30 = vsel %vm513_vm8, %v514_v16, %v1092_v14 }
  0xeb   : > { %v718_v19 = vsel %vm716_vm4, %v1090_v13, %v511_v17  ;;  %v512_v29 = vsel %vm510_vm7, %v1090_v13, %v511_v17 }
  0xec   : > { %v722_v20 = vsel %vm715_vm5, %v718_v19, %v721_v18  ;;  %v516_v34 = vsel %vm509_vm9, %v512_v29, %v515_v30 }
  0xed   : > { %v723_v22 = vsel %vm506_vm6, nan, %v722_v20  ;;  %v517_v45 = vsel %vm506_vm6, nan, %v516_v34 }
  0xee   : > { %806 = vmatprep.subr.mxu0 %v723_v22  ;;  %1008 = vmatprep.subr.mxu1 %v723_v22 }
  0xef   : > { %v1094_v26 = vpop.eup %1093 }
  0xf0   : > { %v1096_v27 = vpop.eup %1095  ;;  %v410_v28 = vxor.u32 2147483648, %v1094_v26 }
  0xf1   : > { %v407_v31 = vxor.u32 2147483648, %v1096_v27 }
  0xf2   : > { %v618_v32 = vsel %vm616_vm11, %v410_v28, %v1096_v27  ;;  %v411_v59 = vsel %vm409_vm12, %v410_v28, %v1096_v27 }
  0xf3   : > { %v615_v33 = vsel %vm613_vm13, %v1094_v26, %v407_v31  ;;  %v408_v37 = vsel %vm406_vm14, %v1094_v26, %v407_v31 }
  0xf4   : > { %v619_v42 = vsel %vm612_vm10, %v615_v33, %v618_v32  ;;  %v412_v43 = vsel %vm405_vm15, %v408_v37, %v411_v59 }
  0xf5   : > { %v620_v44 = vsel %vm402_vm0, nan, %v619_v42  ;;  %v413_v35 = vsel %vm402_vm0, nan, %v412_v43 }
  0xf6   : > { %807 = vmatpush1.msra.mxu0 %v620_v44  ;;  %1011 = vmatpush1.msra.mxu1 %v620_v44 }
  0xf7   : > { %808 = vmatprep.subr.mxu0 %v517_v45  ;;  %1009 = vmatprep.subr.mxu1 %v517_v45 }
  0xf8   : > { %809 = vmatpush1.msra.mxu0 %v413_v35  ;;  %1012 = vmatpush1.msra.mxu1 %v413_v35 }
  0xf9   : > { %996 = vmatmul.mubr.msk.f32.vlgmr.msra.gmra.mxu0 %vm760_vm1, %v732_v46  ;;  %998 = vmatmul.mubr.msk.f32.vlgmr.msra.gmra.mxu1 %vm760_vm1, %v734_v47 }
  0xfa   : > { %848 = vmatprep.mubr.f32.mxu0 %v1177_v25  ;;  %860 = vmatprep.mubr.f32.mxu1 %v1177_v25 }
  0xfd   : > { %997 = vmatmul.mubr.msk.f32.gmra.mxu0 %vm760_vm1, %v733_v36  ;;  %999 = vmatmul.mubr.msk.f32.gmra.mxu1 %vm760_vm1, %v735_v48 }
 0x1b9   : > { %v844_v52 = vpop.f32.mrf.mxu0  ;;  %v856_v54 = vpop.f32.mrf.mxu1 }
 0x1ba   : > { %v845_v25 = vadd.f32 %v844_v52, %v743_v49  ;;  %v857_v55 = vadd.f32 %v856_v54, %v753_v51 }
 0x1bb   : > { %v846_v38 = vpop.f32.mrf.mxu0  ;;  %v858_v41 = vpop.f32.mrf.mxu1 }
 0x1bc   : > { %867 = vst [vmem:[%s242_s25] sm:$0xff] %v845_v25  ;;  %871 = vst [vmem:[%s242_s25 + $0x20] sm:$0xff] %v857_v55  ;;  %v847_v62 = vadd.f32 %v846_v38, %v743_v49  ;;  %v859_v63 = vadd.f32 %v858_v41, %v753_v51 }
 0x1bd   : > { %v850_v61 = vpop.f32.mrf.mxu0  ;;  %v862_v60 = vpop.f32.mrf.mxu1 }
 0x1be   : > { %868 = vst [vmem:[%s242_s25 + $0x8] sm:$0xff] %v847_v62  ;;  %872 = vst [vmem:[%s242_s25 + $0x28] sm:$0xff] %v859_v63  ;;  %v851_v58 = vadd.f32 %v850_v61, %v748_v50  ;;  %v863_v0 = vadd.f32 %v862_v60, %v758_v57 }
 0x1bf   : > { %v852_v1 = vpop.f32.mrf.mxu0  ;;  %v864_v2 = vpop.f32.mrf.mxu1 }
 0x1c0   : > { %869 = vst [vmem:[%s242_s25 + $0x10] sm:$0xff] %v851_v58  ;;  %873 = vst [vmem:[%s242_s25 + $0x30] sm:$0xff] %v863_v0  ;;  %v853_v53 = vadd.f32 %v852_v1, %v748_v50  ;;  %v865_v3 = vadd.f32 %v864_v2, %v758_v57 }
 0x1c2   : > { %870 = vst [vmem:[%s242_s25 + $0x18] sm:$0xff] %v853_v53  ;;  %874 = vst [vmem:[%s242_s25 + $0x38] sm:$0xff] %v865_v3 }
 0x1c3   : > { %1110 = shalt.err (!%p1107_p5)
}
 0x1c4   : > { %s1111_s14 = scalar_lea.hbm %s1396_s9, 1024  ;;  %s1115_s17 = scalar_lea.hbm %s1452_s5, 2048 }
 0x1c5   : > { %p1112_p6 = scmp.ne.s32.totalorder %s1396_s9, %s1111_s14  ;;  %p1116_p10 = scmp.lt.s32.totalorder %s1396_s9, %s1452_s5 }
 0x1c6   : > { %p1117_p11 = scmp.lt.s32.totalorder %s1115_s17, %s1111_s14 }
 0x1c7   : > { %p1113_p7 = pnand %p1112_p6, %p1257_p4 }
 0x1c8   : > { %p1118_p12 = por %p1117_p11, %p1116_p10 }
 0x1c9   : > { %p1114_p9 = pneg %p1113_p7 }
 0x1cb   : > { %p1119_p13 = pnand %p1118_p12, %p1114_p9 }
 0x1cd   : > { %1122 = shalt.err (!%p1119_p13)
}
 0x1ce   : > { %s1185_s27 = smov 256   ;;  %s1186_s7 = smov 16  }
 0x1cf   : > { %1021 = dma.vmem_to_hbm [thread:$0]  (%p1257_p4), %s1398_s29, 1024, %s1396_s9, %s1402_s21, %s1185_s27, %s1185_s27, %s1186_s7  }
 0x1d0 PF: > { %p1027_p0 = scmp.ge.s32.totalorder %s1173_s23, 2  ;;  %s906_s8 = sand.u32 1, %s1153_s18  }
 0x1d1   : > { %s907_s10 = scalar_lea.sflag [#allocation3], %s906_s8 }
 0x1d2   : > { %p1024_p1 = pnand %p1027_p0, %p1264_p8 }
 0x1d4   : > { %p1025_p2 = pneg %p1024_p1 }
 0x1d6   : > { %1148 = dma.done.wait (%p1025_p2), %s907_s10, 1024  }
 0x1d7   : > { %1150 = vsyncadd (%p1025_p2), %s907_s10, 4294966272  ;;  %s18_s23 = sadd.s32 1, %s1173_s23   ;;  %s1457_s18 = smov %s1157_s19 }
 0x1d8   : > { %p15_p3 = scmp.ge.s32.totalorder %s18_s23, 4   ;;  %s1458_s19 = smov %s1161_s20 }
 0x1d9   : > { %s1459_s20 = smov %s1270_s6  ;;  %s1460_s21 = smov %s1169_s22 }
 0x1da   : > { %s1461_s22 = smov %s1463_s26  ;;  %17 = sbr.rel (!%p15_p3) target bundleno = 4 (0x4), region = 75 }
 0x1df   :  { %912 = vsyncpa [#allocation3], 1 }
 0x1e0   :  { %914 = vsyncpa [#allocation3 + $0x1], 1 }

</bundles_post_ra>
